<compile_context>
chip_gen: v6e
topology: v6e:2x2x1
jax: 0.10.0
libtpu: 0.0.40
codegen_flags: <defaults>
</compile_context>

<pallas_src>
import functools
import math

import numpy as np

import jax
import jax.numpy as jnp
from jax.experimental import pallas as pl
from jax.experimental.pallas import tpu as pltpu


# ---------------- Pallas kernel: GCN attention score ----------------

def _gcn_score_kernel(a_ref, v_ref, dinv_ref, b_ref, out_ref, acc_ref):
    # a_ref   : (TM, TC) int8   block of (A_in + I), A_in[i, j] = #edges j -> i
    # v_ref   : (TC, 1)  f32    d * (x @ W) for source nodes (column slice)
    # dinv_ref: (TM, 1)  f32    d = deg^-1/2 for target nodes (row slice)
    # b_ref   : (1,)     f32    GCNConv bias (SMEM scalar)
    # out_ref : (TM, 1)  f32    tanh(score)
    # acc_ref : (TM, 1)  f32    accumulator scratch (lives across column steps)
    j = pl.program_id(1)

    @pl.when(j == 0)
    def _init():
        acc_ref[...] = jnp.zeros_like(acc_ref)

    # int8 -> bf16 upcast + MXU matvec with f32 accumulation (perf review):
    # keeps the kernel HBM/DMA-bound after the int8 shrink, frees VPU/XLU slots.
    a = a_ref[...].astype(jnp.bfloat16)
    v = v_ref[...].astype(jnp.bfloat16)
    acc_ref[...] += jnp.dot(a, v, preferred_element_type=jnp.float32)

    @pl.when(j == pl.num_programs(1) - 1)
    def _finalize():
        # TODO(synk): lane-dense (1, TM) output layout is a possible minor win;
        # skipped since the kernel is A-stream-bound and the store is off-path.
        out_ref[...] = jnp.tanh(dinv_ref[...] * acc_ref[...] + b_ref[0])


def _vmem_capacity_bytes() -> int:
    try:
        return int(pltpu.get_tpu_info().vmem_capacity_bytes)
    except Exception:
        return 64 << 20  # conservative: v7x per-TensorCore physical VMEM


def _plan(n_nodes: int):
    """Generation-aware tile / padding plan for the int8 adjacency stream."""
    cap = _vmem_capacity_bytes()
    if cap >= (96 << 20):              # v5e / v6e: 128 MiB physical VMEM
        budget, vmem_limit = 48 << 20, 64 << 20
    else:                              # v7x: 64 MiB per TensorCore
        budget, vmem_limit = 24 << 20, 40 << 20
    # ~4 bytes of VMEM per streamed adjacency element: double-buffered int8 strip
    # (2 B) + a possibly materialized bf16 upcast temp feeding the MXU (2 B).
    bpe = 4

    n_rows = max(128, -(-n_nodes // 128) * 128)
    if bpe * 512 * n_rows <= budget:
        # single column pass with row blocks >= 512
        tc = n_cols = n_rows
    else:
        # column-reduction axis: few-K wide strips, zero-padded to an exact
        # multiple of TC so ragged reduction blocks never exist.
        tc = 8192
        n_cols = -(-n_rows // tc) * tc

    tm = 32
    for cand in (1024, 512, 256, 128, 64, 32):   # int8 min tile is (32, 128)
        if cand <= n_rows and bpe * cand * tc <= budget:
            tm = cand
            break
    # >= 2 row blocks so dimension_semantics=("parallel", ...) can use both v7x
    # TensorCores (and the pipeline always has >= 2 steps).
    half = max(32, (n_rows // 2) // 32 * 32)
    tm = min(tm, half)
    return tm, tc, n_rows, n_cols, vmem_limit


def gcn_score(a_int8, v_col, dinv_col, b, *, tm, tc, vmem_limit):
    """tanh(GCNConv attention score). Returns (n_rows, 1) f32; caller slices [:N]."""
    n_rows, n_cols = a_int8.shape
    grid = (pl.cdiv(n_rows, tm), pl.cdiv(n_cols, tc))
    return pl.pallas_call(
        _gcn_score_kernel,
        out_shape=jax.ShapeDtypeStruct((n_rows, 1), jnp.float32),
        grid=grid,
        in_specs=[
            pl.BlockSpec((tm, tc), lambda i, j: (i, j)),         # int8 A stream
            pl.BlockSpec((tc, 1), lambda i, j: (j, 0)),          # d * (x @ W)
            pl.BlockSpec((tm, 1), lambda i, j: (i, 0)),          # deg^-1/2 rows
            pl.BlockSpec(memory_space=pltpu.MemorySpace.SMEM),   # bias scalar
        ],
        out_specs=pl.BlockSpec((tm, 1), lambda i, j: (i, 0)),
        scratch_shapes=[pltpu.VMEM((tm, 1), jnp.float32)],
        compiler_params=pltpu.CompilerParams(
            dimension_semantics=("parallel", "arbitrary"),
            vmem_limit_bytes=vmem_limit,
        ),
        cost_estimate=pl.CostEstimate(
            flops=2 * n_rows * n_cols,
            transcendentals=n_rows,
            bytes_accessed=n_rows * n_cols + 4 * n_cols + 12 * n_rows,
        ),
    )(a_int8, v_col, dinv_col, b)


# ---------------- jittable forward core (kernel + glue, no host syncs) ----------------

@functools.partial(jax.jit, static_argnames=("num_graphs", "ratio"))
def _pool_unpool_core(x, edge_index, batch, w, b, *, num_graphs, ratio=0.5):
    N, F = x.shape
    tm, tc, n_rows, n_cols, vmem_limit = _plan(N)
    row, col = edge_index[0], edge_index[1]

    # (A_in + I) with A_in[i, j] = #edges j -> i (PyG flow='source_to_target'
    # aggregates in-neighbours). Stored int8: exact for parallel-edge multiplicity
    # <= 127 and half the HBM bytes of bf16.
    node = jnp.arange(N, dtype=edge_index.dtype)
    tgt_all = jnp.concatenate([col, node])
    src_all = jnp.concatenate([row, node])
    a_in = jnp.zeros((n_rows, n_cols), jnp.int8).at[tgt_all, src_all].add(jnp.int8(1))
    # TODO(synk): for genuinely sparse graphs (E << N^2) replace this dense O(N^2)
    # stream with an O(E) segment-sum / CSR-gather formulation.

    # gcn_norm degrees: in-degree (edge_index[1]) + 1 self loop, as in PyG.
    deg = jnp.zeros((N,), jnp.float32).at[col].add(1.0) + 1.0
    deg_inv_sqrt = 1.0 / jnp.sqrt(deg)
    dinv_rows = jnp.zeros((n_rows, 1), jnp.float32).at[:N, 0].set(deg_inv_sqrt)

    # fold the symmetric normalization into the vector: v = d * (x @ W)
    xw = jnp.dot(x, w, preferred_element_type=jnp.float32)[:, 0]          # (N,)
    v_col = jnp.zeros((n_cols, 1), jnp.float32).at[:N, 0].set(deg_inv_sqrt * xw)

    # Pallas: GCN attention score with tanh nonlinearity
    score = gcn_score(a_in, v_col, dinv_rows, b,
                      tm=tm, tc=tc, vmem_limit=vmem_limit)[:N, 0]         # (N,)

    # TODO(synk): spectral (Fiedler) loss via eigvalsh is discarded by
    # PoolUnpoolGraph.forward, so it is not computed here.

    # ---- torch_geometric topk(ratio) per graph, O(N log N) ----
    counts = jnp.zeros((num_graphs,), jnp.int32).at[batch].add(1)
    k = jnp.ceil(ratio * counts.astype(jnp.float32)).astype(jnp.int32)
    cum_counts = jnp.concatenate([jnp.zeros((1,), jnp.int32), jnp.cumsum(counts)[:-1]])
    cumk = jnp.concatenate([jnp.zeros((1,), jnp.int32), jnp.cumsum(k)[:-1]])

    # sort by (graph asc, score desc, node idx asc) -> per-graph descending order
    order = jnp.lexsort((jnp.arange(N), -score, batch)).astype(jnp.int32)
    sorted_batch = batch[order]
    rank = jnp.arange(N, dtype=jnp.int32) - cum_counts[sorted_batch]
    kept_sorted = rank < k[sorted_batch]
    tgt = cumk[sorted_batch] + rank                       # position in perm if kept

    max_perm = min(N, int(math.ceil(ratio * N)) + num_graphs)   # static bound
    perm_padded = jnp.full((max_perm,), -1, jnp.int32).at[
        jnp.where(kept_sorted, tgt, max_perm)].set(order, mode="drop")
    num_kept = jnp.sum(k)

    new_idx = jnp.full((N,), -1, jnp.int32).at[order].set(jnp.where(kept_sorted, tgt, -1))
    keep = jnp.zeros((N,), jnp.bool_).at[order].set(kept_sorted)

    # ---- unpool: x_unpooled[perm] = x[perm] * score[perm]  ==  x * score * keep ----
    # left to XLA as a fused broadcast multiply (F = 8 << 128 lanes; a masked-store
    # Pallas kernel would cost more in launch overhead than the work).
    gate = jnp.where(keep, score, 0.0)
    x_unpooled = x * gate[:, None]

    # ---- filter_adj: keep edges with both endpoints kept, remap to perm positions ----
    rn, cn = new_idx[row], new_idx[col]
    e_valid = (rn >= 0) & (cn >= 0)
    edge_remapped = jnp.stack([jnp.where(e_valid, rn, -1),
                               jnp.where(e_valid, cn, -1)]).astype(jnp.int32)

    return x_unpooled, edge_remapped, e_valid, batch, perm_padded, num_kept


def pool_unpool_graph(x, edge_index, batch, w, b, *, num_graphs, ratio=0.5):
    (x_unpooled, edge_remapped, e_valid, batch_out,
     perm_padded, num_kept) = _pool_unpool_core(
        x, edge_index, batch, w, b, num_graphs=num_graphs, ratio=ratio)
    # dynamic-shape compaction happens once, host-side, after the single jit call
    e_valid_np = np.asarray(e_valid)
    edge_index_unpooled = jnp.asarray(np.asarray(edge_remapped)[:, e_valid_np])
    perm = perm_padded[: int(num_kept)]
    return x_unpooled, edge_index_unpooled, batch_out, perm


# ---------------- demo ----------------

if __name__ == "__main__":
    key = jax.random.PRNGKey(0)
    k1, k2 = jax.random.split(key, 2)

    N, F = 16, 8          # 16 nodes, 8 features, 2 graphs of 8 nodes
    x = jax.random.normal(k1, (N, F), jnp.float32)

    # two undirected ring graphs of 8 nodes each
    edges = []
    for g in range(2):
        off = g * 8
        for i in range(8):
            a_node, b_node = off + i, off + (i + 1) % 8
            edges.append((a_node, b_node))
            edges.append((b_node, a_node))
    edge_index = jnp.array(edges, jnp.int32).T          # (2, 32)
    batch = jnp.array([0] * 8 + [1] * 8, jnp.int32)     # (16,)

    # GCNConv(num_node_features, 1) params, deterministic glorot-ish init
    w = jax.random.normal(k2, (F, 1), jnp.float32) * math.sqrt(2.0 / (F + 1))
    b = jnp.zeros((1,), jnp.float32)

    x_unpooled, edge_index_unpooled, batch_out, perm = pool_unpool_graph(
        x, edge_index, batch, w, b, num_graphs=2, ratio=0.5
    )
    jax.block_until_ready(x_unpooled)
    jax.block_until_ready(edge_index_unpooled)
    jax.block_until_ready(batch_out)
    jax.block_until_ready(perm)

    assert x_unpooled.shape == (N, F)
    assert edge_index_unpooled.shape[0] == 2
    assert perm.shape[0] == 8  # ceil(0.5 * 8) per graph, 2 graphs
    assert bool(jnp.all(jnp.isfinite(x_unpooled)))

    # numeric sanity check: Pallas GCN score vs dense f32 reference
    row_e, col_e = edge_index[0], edge_index[1]
    deg = jnp.zeros((N,), jnp.float32).at[col_e].add(1.0) + 1.0
    d = 1.0 / jnp.sqrt(deg)
    a_dense = jnp.zeros((N, N), jnp.float32).at[col_e, row_e].add(1.0) + jnp.eye(N)
    xw = (x @ w)[:, 0]
    ref_score = jnp.tanh(d * (a_dense @ (d * xw)) + b[0])

    tm_, tc_, n_rows_, n_cols_, lim_ = _plan(N)
    node = jnp.arange(N, dtype=jnp.int32)
    a_pad = jnp.zeros((n_rows_, n_cols_), jnp.int8).at[
        jnp.concatenate([col_e, node]), jnp.concatenate([row_e, node])].add(jnp.int8(1))
    dinv_pad = jnp.zeros((n_rows_, 1), jnp.float32).at[:N, 0].set(d)
    v_pad = jnp.zeros((n_cols_, 1), jnp.float32).at[:N, 0].set(d * xw)
    score_pallas = gcn_score(a_pad, v_pad, dinv_pad, b,
                             tm=tm_, tc=tc_, vmem_limit=lim_)[:N, 0]
    jax.block_until_ready(score_pallas)
    assert bool(jnp.allclose(score_pallas, ref_score, atol=2e-2, rtol=2e-2))

    print("KERNEL_OK")
</pallas_src>

<mosaic_0001>
module attributes {stable_mosaic.version = 11 : i64} {
  func.func private @main(%arg0: i32) attributes {dimension_semantics = [#tpu.dimension_semantics<core_parallel>], iteration_bounds = array<i64: 2>, tpu.core_type = #tpu.core_type<sc_scalar_subcore>, window_params = []} {
    return
  }
}

module attributes {stable_mosaic.version = 11 : i64} {
  func.func private @main(%arg0: i32) attributes {dimension_semantics = [#tpu.dimension_semantics<core_parallel>], iteration_bounds = array<i64: 2>, tpu.core_type = #tpu.core_type<sc_scalar_subcore>, window_params = []} {
    return
  }
}

module attributes {stable_mosaic.version = 11 : i64} {
  func.func @_gcn_score_kernel(%arg0: i32, %arg1: i32, %arg2: memref<64x128xi8, #tpu.memory_space<vmem>>, %arg3: memref<128x1xf32, #tpu.memory_space<vmem>>, %arg4: memref<64x1xf32, #tpu.memory_space<vmem>>, %arg5: memref<1xf32, #tpu.memory_space<smem>>, %arg6: memref<64x1xf32, #tpu.memory_space<vmem>>, %arg7: memref<64x1xf32, #tpu.memory_space<vmem>>) attributes {dimension_semantics = [#tpu.dimension_semantics<parallel>, #tpu.dimension_semantics<arbitrary>], iteration_bounds = array<i64: 2, 1>, scalar_prefetch = 0 : i64, scratch_operands = 1 : i64, tpu.core_type = #tpu.core_type<tc>, window_params = [{transform_indices = @transform_0, window_bounds = array<i64: 64, 128>}, {transform_indices = @transform_1, window_bounds = array<i64: 128, 1>}, {transform_indices = @transform_2, window_bounds = array<i64: 64, 1>}, {transform_indices = @transform_3, window_bounds = array<i64: 1>}, {transform_indices = @transform_4, window_bounds = array<i64: 64, 1>}]} {
    %c0_i32 = arith.constant 0 : i32
    %0 = arith.cmpi eq, %arg1, %c0_i32 : i32
    %1 = arith.extui %0 : i1 to i32
    %c0_i32_0 = arith.constant 0 : i32
    %2 = arith.cmpi ne, %1, %c0_i32_0 : i32
    scf.if %2 {
      %cst_10 = arith.constant 0.000000e+00 : f32
      %14 = vector.broadcast %cst_10 : f32 to vector<64x1xf32>
      %c0_11 = arith.constant 0 : index
      %c0_12 = arith.constant 0 : index
      %15 = vector.load %arg7[%c0_11, %c0_12] : memref<64x1xf32, #tpu.memory_space<vmem>>, vector<64x1xf32>
      tpu.vector_store %arg7[%c0_11, %c0_12], %14 {strides = array<i32>} : memref<64x1xf32, #tpu.memory_space<vmem>>, vector<64x1xf32>,
    } else {
    }
    %c0 = arith.constant 0 : index
    %c0_1 = arith.constant 0 : index
    %3 = vector.load %arg2[%c0, %c0_1] : memref<64x128xi8, #tpu.memory_space<vmem>>, vector<64x128xi8>
    %4 = arith.sitofp %3 : vector<64x128xi8> to vector<64x128xbf16>
    %c0_2 = arith.constant 0 : index
    %c0_3 = arith.constant 0 : index
    %5 = vector.load %arg3[%c0_2, %c0_3] : memref<128x1xf32, #tpu.memory_space<vmem>>, vector<128x1xf32>
    %6 = arith.truncf %5 : vector<128x1xf32> to vector<128x1xbf16>
    %c0_4 = arith.constant 0 : index
    %c0_5 = arith.constant 0 : index
    %7 = vector.load %arg7[%c0_4, %c0_5] : memref<64x1xf32, #tpu.memory_space<vmem>>, vector<64x1xf32>
    %cst = arith.constant dense<0.000000e+00> : vector<64x1xf32>
    %8 = tpu.matmul %4, %6, %cst {dimension_numbers = #tpu.dot_dimension_numbers<[1], [0], [0], [1], [0, 0, 1, 1], [], []>} : vector<64x128xbf16>, vector<128x1xbf16>, vector<64x1xf32> -> vector<64x1xf32>
    %9 = arith.addf %7, %8 : vector<64x1xf32>
    %c0_6 = arith.constant 0 : index
    %c0_7 = arith.constant 0 : index
    %10 = vector.load %arg7[%c0_6, %c0_7] : memref<64x1xf32, #tpu.memory_space<vmem>>, vector<64x1xf32>
    tpu.vector_store %arg7[%c0_6, %c0_7], %9 {strides = array<i32>} : memref<64x1xf32, #tpu.memory_space<vmem>>, vector<64x1xf32>,
    %c0_i32_8 = arith.constant 0 : i32
    %11 = arith.cmpi eq, %arg1, %c0_i32_8 : i32
    %12 = arith.extui %11 : i1 to i32
    %c0_i32_9 = arith.constant 0 : i32
    %13 = arith.cmpi ne, %12, %c0_i32_9 : i32
    scf.if %13 {
      %c0_10 = arith.constant 0 : index
      %c0_11 = arith.constant 0 : index
      %14 = vector.load %arg4[%c0_10, %c0_11] : memref<64x1xf32, #tpu.memory_space<vmem>>, vector<64x1xf32>
      %c0_12 = arith.constant 0 : index
      %c0_13 = arith.constant 0 : index
      %15 = vector.load %arg7[%c0_12, %c0_13] : memref<64x1xf32, #tpu.memory_space<vmem>>, vector<64x1xf32>
      %16 = arith.mulf %14, %15 : vector<64x1xf32>
      %c0_14 = arith.constant 0 : index
      %17 = memref.load %arg5[%c0_14] : memref<1xf32, #tpu.memory_space<smem>>
      %18 = vector.broadcast %17 : f32 to vector<64x1xf32>
      %19 = arith.addf %16, %18 : vector<64x1xf32>
      %20 = math.tanh %19 : vector<64x1xf32>
      %c0_15 = arith.constant 0 : index
      %c0_16 = arith.constant 0 : index
      %21 = vector.load %arg6[%c0_15, %c0_16] : memref<64x1xf32, #tpu.memory_space<vmem>>, vector<64x1xf32>
      tpu.vector_store %arg6[%c0_15, %c0_16], %20 {strides = array<i32>} : memref<64x1xf32, #tpu.memory_space<vmem>>, vector<64x1xf32>,
    } else {
    }
    return
  }
  func.func @transform_0(%arg0: i32, %arg1: i32) -> (i32, i32) {
    %c0_i32 = arith.constant 0 : i32
    return %arg0, %arg1 : i32, i32
  }
  func.func @transform_1(%arg0: i32, %arg1: i32) -> (i32, i32) {
    %c0_i32 = arith.constant 0 : i32
    %c0_i32_0 = arith.constant 0 : i32
    return %arg1, %c0_i32 : i32, i32
  }
  func.func @transform_2(%arg0: i32, %arg1: i32) -> (i32, i32) {
    %c0_i32 = arith.constant 0 : i32
    %c0_i32_0 = arith.constant 0 : i32
    return %arg0, %c0_i32 : i32, i32
  }
  func.func @transform_3(%arg0: i32, %arg1: i32) -> i32 {
    %c0_i32 = arith.constant 0 : i32
    %c0_i32_0 = arith.constant 0 : i32
    return %c0_i32 : i32
  }
  func.func @transform_4(%arg0: i32, %arg1: i32) -> (i32, i32) {
    %c0_i32 = arith.constant 0 : i32
    %c0_i32_0 = arith.constant 0 : i32
    return %arg0, %c0_i32 : i32, i32
  }
}

</mosaic_0001>

<bundles_post_ra>
// kernel: neg.1
= control target key start
LH: loop header
LB: loop body
LE: loop exit
PB: predicated region body
PF: predicated region fallthrough
CT: control target
= control target key end

     0   :  { %s24_s0 = inlined_call_operand.vmem [shape: f32[16], index: 0, kind: input, shape index: {}]   ;;  %s25_s1 = inlined_call_operand.vmem [shape: f32[16], index: 1, kind: output, shape index: {}]  }
   0x1   :  { %v2_v0 = vld [vmem:[%s24_s0] sm:$0x1] }
   0x2   :  { %v5_v1 = vxor.u32 2147483648, %v2_v0 }
   0x4   :  { %7 = vst [vmem:[%s25_s1] sm:$0x1] %v5_v1 }

// kernel: _pool_unpool_core.1
= control target key start
LH: loop header
LB: loop body
LE: loop exit
PB: predicated region body
PF: predicated region fallthrough
CT: control target
= control target key end

     0   :  { %s749_s17 = smov 0   ;;  %s751_s18 = smov 0   ;;  %s894_s0 = inlined_call_operand.vmem [shape: s8[128,128], index: 0, kind: input, shape index: {}]   ;;  %s895_s1 = inlined_call_operand.vmem [shape: f32[128,1], index: 1, kind: input, shape index: {}]   ;;  %s896_s2 = inlined_call_operand.vmem [shape: f32[128,1], index: 2, kind: input, shape index: {}]   ;;  %s897_s3 = inlined_call_operand.<no memory space> [shape: f32[1], index: 3, kind: input, shape index: {}]   ;;  %s898_s4 = inlined_call_operand.vmem [shape: f32[128,1], index: 4, kind: output, shape index: {}]  }
   0x1   :  { %9 = sst [smem:[#allocation3]] %s897_s3  ;;  %s753_s19 = smov 0  }
   0x2 LB: > { %s27_s3 = sadd.s32 1, %s714_s18  ;;  %p590_p0 = scmp.ge.s32.totalorder %s718_s19, 1  ;;  %s718_s19 = sphi %s753_s19, %s15_s19   ;;  %s714_s18 = sphi %s751_s18, %s901_s18   ;;  %s710_s17 = sphi %s749_s17, %s900_s17  }
   0x3   : > { %p29_p1 = scmp.ge.s32.totalorder %s27_s3, 2  ;;  %p203_p2 = scmp.lt.s32.totalorder %s718_s19, 3 }
   0x5   : > { %s903_s3 = smov (%p29_p1, %s27_s3), 0  ;;  %p204_p3 = pnand %p590_p0, %p203_p2 }
   0x6   : > { %s591_s26 = sshll.u32 (!%p204_p3), %s710_s17, 3  ;;  %s464_s10 = sld [smem:[#allocation3]] (!%p204_p3) }
   0x7   : > { %207 = sbr.rel (%p204_p3) target bundleno = 276 (0x114), region = 36  ;;  %p782_p4 = scmp.lt.s32.totalorder (!%p204_p3), %s591_s26, 15 }
   0xc   : > { %v313_v0 = vld [vmem:[%s895_s1 + $0x70] sm:$0xff]  ;;  %v314_v1 = vld [vmem:[%s895_s1 + $0x78] sm:$0xff]  ;;  %v311_v2 = vld [vmem:[%s895_s1 + $0x60] sm:$0xff]  ;;  %vm274_vm0 = vcmask 7168   ;;  %v720_v5 = vmov 0.0   ;;  %s905_s26 = smov (!%p782_p4, %s591_s26), 15 }
   0xd   : > { %v322_v3 = vpack.c.bf16 %v314_v1, %v313_v0  ;;  %v312_v4 = vld [vmem:[%s895_s1 + $0x68] sm:$0xff]  ;;  %277 = vst.msk [vmem:[#allocation2 + $0x10] sm:$0xff] %vm274_vm0, %v720_v5  ;;  %275 = vst.msk [vmem:[#allocation2] sm:$0xff] %vm274_vm0, %v720_v5  ;;  %v309_v7 = vld [vmem:[%s895_s1 + $0x50] sm:$0xff]  ;;  %s592_s8 = sshll.u32 %s905_s26, 1  ;;  %s594_s9 = sshll.u32 %s905_s26, 3 }
   0xe   : > { %276 = vst.msk [vmem:[#allocation2 + $0x8] sm:$0xff] %vm274_vm0, %v720_v5  ;;  %278 = vst.msk [vmem:[#allocation2 + $0x18] sm:$0xff] %vm274_vm0, %v720_v5  ;;  %v321_v6 = vpack.c.bf16 %v312_v4, %v311_v2  ;;  %v310_v8 = vld [vmem:[%s895_s1 + $0x58] sm:$0xff]  ;;  %v307_v10 = vld [vmem:[%s895_s1 + $0x40] sm:$0xff]  ;;  %s814_s15 = scalar_lea.vmem %s894_s0, %s592_s8  ;;  %s856_s13 = scalar_lea.vmem %s896_s2, %s594_s9 }
   0xf   : > { %279 = vst.msk [vmem:[#allocation2 + $0x20] sm:$0xff] %vm274_vm0, %v720_v5  ;;  %280 = vst.msk [vmem:[#allocation2 + $0x28] sm:$0xff] %vm274_vm0, %v720_v5  ;;  %615 = vmatprep.subr.bf16.mxu0 %v322_v3  ;;  %639 = vmatprep.subr.bf16.mxu1 %v322_v3  ;;  %v320_v9 = vpack.c.bf16 %v310_v8, %v309_v7  ;;  %v308_v11 = vld [vmem:[%s895_s1 + $0x48] sm:$0xff]  ;;  %v283_v12 = vld [vmem:[%s814_s15] sm:$0x3]  ;;  %s267_s16 = scalar_lea.vmem %s898_s4, %s594_s9 }
  0x10   : > { %281 = vst.msk [vmem:[#allocation2 + $0x30] sm:$0xff] %vm274_vm0, %v720_v5  ;;  %282 = vst.msk [vmem:[#allocation2 + $0x38] sm:$0xff] %vm274_vm0, %v720_v5  ;;  %616 = vmatpush3.bf16.msra.mxu0 %v322_v3  ;;  %647 = vmatpush3.bf16.msra.mxu1 %v322_v3  ;;  %v284_v13 = vld [vmem:[%s814_s15 + $0x2] sm:$0x3]  ;;  %v287_v14 = vld [vmem:[%s814_s15 + $0x8] sm:$0x3]  ;;  %v291_v15 = vunpack.c.l.s8.bf16 %v283_v12  ;;  %v319_v19 = vpack.c.bf16 %v308_v11, %v307_v10 }
  0x11   : > { %617 = vmatprep.subr.bf16.mxu0 %v321_v6  ;;  %640 = vmatprep.subr.bf16.mxu1 %v321_v6  ;;  %v292_v16 = vunpack.c.l.s8.bf16 %v284_v13  ;;  %v288_v17 = vld [vmem:[%s814_s15 + $0xa] sm:$0x3]  ;;  %v295_v18 = vunpack.c.l.s8.bf16 %v287_v14  ;;  %v305_v21 = vld [vmem:[%s895_s1 + $0x30] sm:$0xff]  ;;  %v306_v22 = vld [vmem:[%s895_s1 + $0x38] sm:$0xff] }
  0x12   : > { %v296_v20 = vunpack.c.l.s8.bf16 %v288_v17  ;;  %v318_v25 = vpack.c.bf16 %v306_v22, %v305_v21  ;;  %v303_v26 = vld [vmem:[%s895_s1 + $0x20] sm:$0xff]  ;;  %v304_v27 = vld [vmem:[%s895_s1 + $0x28] sm:$0xff]  ;;  %v301_v29 = vld [vmem:[%s895_s1 + $0x10] sm:$0xff] }
  0x13   : > { %v597_v23 = vcombine.low %v291_v15, %v292_v16  ;;  %v317_v28 = vpack.c.bf16 %v304_v27, %v303_v26  ;;  %v302_v30 = vld [vmem:[%s895_s1 + $0x18] sm:$0xff]  ;;  %v299_v32 = vld [vmem:[%s895_s1] sm:$0xff]  ;;  %v300_v33 = vld [vmem:[%s895_s1 + $0x8] sm:$0xff] }
  0x14   : > { %618 = vmatpush3.bf16.msra.mxu0 %v321_v6  ;;  %648 = vmatpush3.bf16.msra.mxu1 %v321_v6  ;;  %v599_v24 = vcombine.low %v295_v18, %v296_v20  ;;  %v316_v31 = vpack.c.bf16 %v302_v30, %v301_v29  ;;  %v285_v34 = vld [vmem:[%s814_s15 + $0x4] sm:$0x3]  ;;  %v286_v35 = vld [vmem:[%s814_s15 + $0x6] sm:$0x3]  ;;  %v289_v36 = vld [vmem:[%s814_s15 + $0xc] sm:$0x3]  ;;  %v315_v38 = vpack.c.bf16 %v300_v33, %v299_v32 }
  0x15   : > { %619 = vmatprep.subr.bf16.mxu0 %v320_v9  ;;  %641 = vmatprep.subr.bf16.mxu1 %v320_v9  ;;  %v290_v37 = vld [vmem:[%s814_s15 + $0xe] sm:$0x3]  ;;  %v293_v39 = vunpack.c.l.s8.bf16 %v285_v34  ;;  %v294_v40 = vunpack.c.l.s8.bf16 %v286_v35  ;;  %v297_v41 = vunpack.c.l.s8.bf16 %v289_v36  ;;  %v325_v45 = vld [vmem:[#allocation2 + $0x10] sm:$0xff]  ;;  %v323_v49 = vld [vmem:[#allocation2] sm:$0xff] }
  0x16   : > { %631 = vmatprep.mubr.bf16.mxu0 %v597_v23  ;;  %635 = vmatprep.mubr.bf16.mxu1 %v599_v24  ;;  %v298_v42 = vunpack.c.l.s8.bf16 %v290_v37  ;;  %v327_v50 = vld [vmem:[#allocation2 + $0x20] sm:$0xff]  ;;  %v326_v55 = vld [vmem:[#allocation2 + $0x18] sm:$0xff]  ;;  %v324_v61 = vld [vmem:[#allocation2 + $0x8] sm:$0xff] }
  0x17   : > { %v598_v43 = vcombine.low %v293_v39, %v294_v40  ;;  %v329_v46 = vld [vmem:[#allocation2 + $0x30] sm:$0xff]  ;;  %v330_v56 = vld [vmem:[#allocation2 + $0x38] sm:$0xff]  ;;  %v328_v62 = vld [vmem:[#allocation2 + $0x28] sm:$0xff] }
  0x18   : > { %620 = vmatpush3.bf16.msra.mxu0 %v320_v9  ;;  %649 = vmatpush3.bf16.msra.mxu1 %v320_v9  ;;  %v600_v44 = vcombine.low %v297_v41, %v298_v42  ;;  %v442_v5 = vld [vmem:[%s856_s13 + $0x10] sm:$0xff]  ;;  %v440_v7 = vld [vmem:[%s856_s13] sm:$0xff]  ;;  %v465_v9 = vstv %s464_s10  ;;  %v443_v16 = vld [vmem:[%s856_s13 + $0x18] sm:$0xff] }
  0x19   : > { %621 = vmatprep.subr.bf16.mxu0 %v319_v19  ;;  %642 = vmatprep.subr.bf16.mxu1 %v319_v19  ;;  %v446_v6 = vld [vmem:[%s856_s13 + $0x30] sm:$0xff]  ;;  %v444_v11 = vld [vmem:[%s856_s13 + $0x20] sm:$0xff]  ;;  %v447_v21 = vld [vmem:[%s856_s13 + $0x38] sm:$0xff] }
  0x1a   : > { %v441_v22 = vld [vmem:[%s856_s13 + $0x8] sm:$0xff] }
  0x1c   : > { %622 = vmatpush3.bf16.msra.mxu0 %v319_v19  ;;  %650 = vmatpush3.bf16.msra.mxu1 %v319_v19 }
  0x1d   : > { %623 = vmatprep.subr.bf16.mxu0 %v318_v25  ;;  %643 = vmatprep.subr.bf16.mxu1 %v318_v25 }
  0x20   : > { %624 = vmatpush3.bf16.msra.mxu0 %v318_v25  ;;  %651 = vmatpush3.bf16.msra.mxu1 %v318_v25  ;;  %v445_v25 = vld [vmem:[%s856_s13 + $0x28] sm:$0xff] }
  0x21   : > { %625 = vmatprep.subr.bf16.mxu0 %v317_v28  ;;  %644 = vmatprep.subr.bf16.mxu1 %v317_v28 }
  0x24   : > { %626 = vmatpush3.bf16.msra.mxu0 %v317_v28  ;;  %652 = vmatpush3.bf16.msra.mxu1 %v317_v28 }
  0x25   : > { %627 = vmatprep.subr.bf16.mxu0 %v316_v31  ;;  %645 = vmatprep.subr.bf16.mxu1 %v316_v31 }
  0x28   : > { %628 = vmatpush3.bf16.msra.mxu0 %v316_v31  ;;  %653 = vmatpush3.bf16.msra.mxu1 %v316_v31 }
  0x29   : > { %629 = vmatprep.subr.bf16.mxu0 %v315_v38  ;;  %646 = vmatprep.subr.bf16.mxu1 %v315_v38 }
  0x2c   : > { %630 = vmatpush3.bf16.msra.mxu0 %v315_v38  ;;  %654 = vmatpush3.bf16.msra.mxu1 %v315_v38 }
  0x2f   : > { %632 = vmatmul.mubr.bf16.vlgmr.msra.gmra.mxu0 %v598_v43  ;;  %636 = vmatmul.mubr.bf16.vlgmr.msra.gmra.mxu1 %v600_v44 }
  0xef   : > { %v633_v47 = vpop.f32.mrf.mxu0  ;;  %v637_v48 = vpop.f32.mrf.mxu1 }
  0xf0   : > { %v422_v51 = vadd.f32 %v633_v47, %v325_v45  ;;  %v426_v52 = vadd.f32 %v637_v48, %v329_v46 }
  0xf1   : > { %v389_v53 = vpop.f32.mrf.mxu0  ;;  %v405_v54 = vpop.f32.mrf.mxu1 }
  0xf2   : > { %431 = vst.msk [vmem:[#allocation2 + $0x10] sm:$0xff] %vm274_vm0, %v422_v51  ;;  %435 = vst.msk [vmem:[#allocation2 + $0x30] sm:$0xff] %vm274_vm0, %v426_v52  ;;  %v420_v57 = vadd.f32 %v389_v53, %v323_v49  ;;  %v424_v58 = vadd.f32 %v405_v54, %v327_v50 }
  0xf3   : > { %v634_v59 = vpop.f32.mrf.mxu0  ;;  %v638_v60 = vpop.f32.mrf.mxu1 }
  0xf4   : > { %429 = vst.msk [vmem:[#allocation2] sm:$0xff] %vm274_vm0, %v420_v57  ;;  %433 = vst.msk [vmem:[#allocation2 + $0x20] sm:$0xff] %vm274_vm0, %v424_v58  ;;  %v423_v63 = vadd.f32 %v634_v59, %v326_v55  ;;  %v427_v0 = vadd.f32 %v638_v60, %v330_v56 }
  0xf5   : > { %v392_v1 = vpop.f32.mrf.mxu0  ;;  %v408_v2 = vpop.f32.mrf.mxu1 }
  0xf6   : > { %432 = vst.msk [vmem:[#allocation2 + $0x18] sm:$0xff] %vm274_vm0, %v423_v63  ;;  %436 = vst.msk [vmem:[#allocation2 + $0x38] sm:$0xff] %vm274_vm0, %v427_v0  ;;  %v421_v3 = vadd.f32 %v392_v1, %v324_v61  ;;  %v425_v4 = vadd.f32 %v408_v2, %v328_v62 }
  0xf8   : > { %430 = vst.msk [vmem:[#allocation2 + $0x8] sm:$0xff] %vm274_vm0, %v421_v3  ;;  %434 = vst.msk [vmem:[#allocation2 + $0x28] sm:$0xff] %vm274_vm0, %v425_v4 }
  0xf9   : > { %v450_v8 = vld [vmem:[#allocation2 + $0x10] sm:$0xff] }
  0xfa   : > { %v454_v10 = vld [vmem:[#allocation2 + $0x30] sm:$0xff]  ;;  %v458_v12 = vmul.f32 %v450_v8, %v442_v5 }
  0xfb   : > { %v462_v13 = vmul.f32 %v454_v10, %v446_v6  ;;  %v448_v14 = vld [vmem:[#allocation2] sm:$0xff] }
  0xfc   : > { %v452_v15 = vld [vmem:[#allocation2 + $0x20] sm:$0xff]  ;;  %v468_v17 = vadd.f32 %v465_v9, %v458_v12  ;;  %v456_v19 = vmul.f32 %v448_v14, %v440_v7 }
  0xfd   : > { %v472_v18 = vadd.f32 %v465_v9, %v462_v13  ;;  %v460_v20 = vmul.f32 %v452_v15, %v444_v11  ;;  %v451_v23 = vld [vmem:[#allocation2 + $0x18] sm:$0xff] }
  0xfe   : > { %v455_v24 = vld [vmem:[#allocation2 + $0x38] sm:$0xff]  ;;  %680 = vtanh.f32 %v468_v17  ;;  %v466_v26 = vadd.f32 %v465_v9, %v456_v19  ;;  %v459_v28 = vmul.f32 %v451_v23, %v443_v16 }
  0xff   : > { %v470_v27 = vadd.f32 %v465_v9, %v460_v20  ;;  %682 = vtanh.f32 %v472_v18  ;;  %v463_v29 = vmul.f32 %v455_v24, %v447_v21  ;;  %v449_v30 = vld [vmem:[#allocation2 + $0x8] sm:$0xff] }
 0x100   : > { %v453_v31 = vld [vmem:[#allocation2 + $0x28] sm:$0xff]  ;;  %684 = vtanh.f32 %v466_v26  ;;  %v469_v32 = vadd.f32 %v465_v9, %v459_v28  ;;  %v457_v33 = vmul.f32 %v449_v30, %v441_v22 }
 0x101   : > { %v461_v34 = vmul.f32 %v453_v31, %v445_v25  ;;  %686 = vtanh.f32 %v470_v27  ;;  %v473_v35 = vadd.f32 %v465_v9, %v463_v29 }
 0x102   : > { %688 = vtanh.f32 %v469_v32  ;;  %v467_v36 = vadd.f32 %v465_v9, %v457_v33 }
 0x103   : > { %v471_v37 = vadd.f32 %v465_v9, %v461_v34  ;;  %690 = vtanh.f32 %v473_v35 }
 0x104   : > { %692 = vtanh.f32 %v467_v36 }
 0x105   : > { %694 = vtanh.f32 %v471_v37 }
 0x10b   : > { %v681_v38 = vpop.eup %680 }
 0x10c   : > { %v683_v39 = vpop.eup %682  ;;  %484 = vst.msk [vmem:[%s267_s16 + $0x10] sm:$0xff] %vm274_vm0, %v681_v38 }
 0x10d   : > { %v685_v40 = vpop.eup %684  ;;  %488 = vst.msk [vmem:[%s267_s16 + $0x30] sm:$0xff] %vm274_vm0, %v683_v39 }
 0x10e   : > { %v687_v41 = vpop.eup %686  ;;  %482 = vst.msk [vmem:[%s267_s16] sm:$0xff] %vm274_vm0, %v685_v40 }
 0x10f   : > { %v689_v42 = vpop.eup %688  ;;  %486 = vst.msk [vmem:[%s267_s16 + $0x20] sm:$0xff] %vm274_vm0, %v687_v41 }
 0x110   : > { %v691_v43 = vpop.eup %690  ;;  %485 = vst.msk [vmem:[%s267_s16 + $0x18] sm:$0xff] %vm274_vm0, %v689_v42 }
 0x111   : > { %v693_v44 = vpop.eup %692  ;;  %489 = vst.msk [vmem:[%s267_s16 + $0x38] sm:$0xff] %vm274_vm0, %v691_v43 }
 0x112   : > { %v695_v45 = vpop.eup %694  ;;  %483 = vst.msk [vmem:[%s267_s16 + $0x8] sm:$0xff] %vm274_vm0, %v693_v44 }
 0x113   : > { %487 = vst.msk [vmem:[%s267_s16 + $0x28] sm:$0xff] %vm274_vm0, %v695_v45 }
 0x114 PF: > { %s15_s19 = sadd.s32 1, %s718_s19   ;;  %s900_s17 = smov %s714_s18 }
 0x115   : > { %p12_p5 = scmp.ge.s32.totalorder %s15_s19, 4   ;;  %s901_s18 = smov %s903_s3 }
 0x117   :  { %14 = sbr.rel (!%p12_p5) target bundleno = 2 (0x2), region = 80 }

</bundles_post_ra>
